<compile_context>
chip_gen: v7x
topology: tpu7x:2x2x1
jax: 0.10.0
libtpu: 0.0.40
codegen_flags: <defaults>
</compile_context>

<pallas_src>
import functools

import jax
import jax.numpy as jnp
from jax.experimental import pallas as pl
from jax.experimental.pallas import tpu as pltpu


def _elu(v):
    # F.elu with alpha=1.0 (exp lowers to the EUP; min() guards the untaken
    # branch against overflow).
    return jnp.where(v > 0, v, jnp.exp(jnp.minimum(v, 0.0)) - 1.0)


# ----------------------------------------------------------------------------
# Parameter-slab layout: one lane-padded f32 slab, each block 8-row aligned.
# ----------------------------------------------------------------------------
def _slab_layout(C, HC, T2p, H2, H3, OUT):
    entries = [
        ("wc0", C, HC), ("wc1", C, HC), ("wc2", C, HC), ("b3", 1, HC),
        ("w1c", HC, 2), ("b1c", 1, 2),
        ("wf0", T2p, H2), ("wf1", T2p, H2), ("b1", 1, H2),
        ("w2", H2, H2), ("b2", 1, H2),
        ("w3", H2, H3), ("b3l", 1, H3),
        ("w4", H3, OUT), ("b4", 1, OUT),
    ]
    width = max(c for _, _, c in entries)
    layout, off = {}, 0
    for name, r, c in entries:
        layout[name] = (off, r, c)
        off += -(-r // 8) * 8            # align each block to a sublane tile
    return layout, off, width


# ----------------------------------------------------------------------------
# Single fused kernel: whole batch, whole network, one invocation.
# Activation row layout: rows ordered (sample, time), channels on lanes.
# ----------------------------------------------------------------------------
def fused_nn_kernel(x_ref, p_ref, o_ref, s1_ref, s2_ref, *, meta):
    f32 = jnp.float32
    L, C, HC = meta["L"], meta["C"], meta["HC"]
    T2p, H2 = meta["T2p"], meta["H2"]
    layout = meta["layout"]

    M = x_ref.shape[0]                   # N * L rows
    N = M // L
    Mh, Mq = M // 2, M // 4

    def par(name):                       # static slice into the packed slab
        off, r, c = layout[name]
        return p_ref[off:off + r, 0:c]

    def shift_up(a, k):
        # rows shifted by k (wrap); wrapped rows only ever land in per-sample
        # padding slots that are discarded downstream.
        return jnp.concatenate([a[k:], a[:k]], axis=0)

    # bn_l0 + conv_3 (k=3): three accumulated MXU matmuls over (M, C) rows.
    # Row n*L+p is the conv output at position p; p in {L-2, L-1} is junk and
    # never read by valid pooling windows.
    xv = x_ref[...]
    z1 = (jnp.dot(xv, par("wc0"), preferred_element_type=f32)
          + jnp.dot(shift_up(xv, 1), par("wc1"), preferred_element_type=f32)
          + jnp.dot(shift_up(xv, 2), par("wc2"), preferred_element_type=f32)
          + par("b3"))
    s1_ref[...] = z1

    # MaxPool1d(3, stride=2): even/odd taps via stride-2 sublane reads, VPU max.
    # ELU is monotonic -> applied after the max (same result, fewer exps).
    ev = s1_ref[pl.ds(0, Mh, stride=2), :]        # conv positions 2t
    od = s1_ref[pl.ds(1, Mh, stride=2), :]        # conv positions 2t+1
    p1 = _elu(jnp.maximum(jnp.maximum(ev, od), shift_up(ev, 1)))   # (N*L/2, HC)

    # conv_1 (k=1) == plain matmul.
    s2_ref[...] = (jnp.dot(p1, par("w1c"), preferred_element_type=f32)
                   + par("b1c"))                  # (N*L/2, 2)

    # MaxPool1d(2, stride=2) + ELU, again via stride-2 reads + VPU max.
    p2 = _elu(jnp.maximum(s2_ref[pl.ds(0, Mq, stride=2), :],
                          s2_ref[pl.ds(1, Mq, stride=2), :]))      # (N*T2p, 2)

    # Channel-major flatten + bn_l1 + i2o_l1:
    #   h[n] = sum_u p2[n,u,0]*wf0[u] + p2[n,u,1]*wf1[u]   (padded rows are 0)
    # -> VPU broadcast-multiply + per-sample sublane sum; no MXU dispatch.
    p2_3d = p2.reshape(N, T2p, 2)
    mix = (p2_3d[:, :, 0:1] * par("wf0")[None, :, :]
           + p2_3d[:, :, 1:2] * par("wf1")[None, :, :])            # (N, T2p, H2)
    h = _elu(jnp.sum(mix, axis=1) + par("b1"))                     # (N, H2)

    # dropout(eval)=identity; bn_l2/bn_l3 folded into the weights.
    h = _elu(jnp.dot(h, par("w2"), preferred_element_type=f32) + par("b2"))
    h = _elu(jnp.dot(h, par("w3"), preferred_element_type=f32) + par("b3l"))
    o_ref[...] = jnp.dot(h, par("w4"), preferred_element_type=f32) + par("b4")


# ----------------------------------------------------------------------------
# One-time weight folding + packing into a single VMEM slab.
# ----------------------------------------------------------------------------
def fold_params(w3, b3, w1c, b1c, s0, t0, s1, t1, wl1, bl1,
                s2, t2, wl2, bl2, s3, t3, wl3, bl3, wl4, bl4, *, input_size):
    L = input_size
    assert L % 4 == 0, "kernel assumes input_size divisible by 4"
    HC, C, K = w3.shape
    assert K == 3
    T2p = L // 4                 # per-sample row block after both pools (padded)
    T2 = T2p - 1                 # true pooled length == fc_in_size
    H2 = wl2.shape[0]
    H3 = wl3.shape[0]
    OUT = wl4.shape[0]

    s0f, t0f = s0.reshape(-1), t0.reshape(-1)
    s1f, t1f = s1.reshape(-1), t1.reshape(-1)
    s2f, t2f = s2.reshape(-1), t2.reshape(-1)
    s3f, t3f = s3.reshape(-1), t3.reshape(-1)

    # bn_l0 folded into the three conv_3 taps, each (C, HC).
    wtap = [jnp.transpose(w3[:, :, k]) * s0f[:, None] for k in range(3)]
    b3f = b3 + jnp.einsum('hck,c->h', w3, t0f)

    w1cf = jnp.transpose(w1c[:, :, 0])            # (HC, 2)

    # channel-major flatten + bn_l1 folded into i2o_l1; split per conv channel,
    # time-major, zero-padded to T2p rows (so the discarded slots vanish).
    w1f = s1f[:, None] * wl1.T                    # (2*T2, H2)
    b1f = bl1 + t1f @ wl1.T
    wf0 = jnp.zeros((T2p, H2), jnp.float32).at[:T2].set(w1f[:T2])
    wf1 = jnp.zeros((T2p, H2), jnp.float32).at[:T2].set(w1f[T2:2 * T2])

    w2f = s2f[:, None] * wl2.T
    b2f = bl2 + t2f @ wl2.T
    w3lf = s3f[:, None] * wl3.T
    b3lf = bl3 + t3f @ wl3.T
    w4f = wl4.T
    b4f = bl4

    layout, rows, width = _slab_layout(C, HC, T2p, H2, H3, OUT)
    vals = dict(wc0=wtap[0], wc1=wtap[1], wc2=wtap[2], b3=b3f,
                w1c=w1cf, b1c=b1c, wf0=wf0, wf1=wf1, b1=b1f,
                w2=w2f, b2=b2f, w3=w3lf, b3l=b3lf, w4=w4f, b4=b4f)
    slab = jnp.zeros((rows, width), jnp.float32)
    for name, (off, r, c) in layout.items():
        slab = slab.at[off:off + r, 0:c].set(
            jnp.asarray(vals[name], jnp.float32).reshape(r, c))

    meta = dict(L=L, C=C, HC=HC, T2p=T2p, T2=T2, H2=H2, H3=H3, OUT=OUT,
                layout=layout)
    return slab, meta


# ----------------------------------------------------------------------------
# Wrapper: layout plumbing + pallas_call.
# ----------------------------------------------------------------------------
def make_forward(meta):
    L, C, HC, OUT = meta["L"], meta["C"], meta["HC"], meta["OUT"]
    kernel = functools.partial(fused_nn_kernel, meta=meta)

    def forward(x, pslab):
        N = x.shape[0]
        assert x.shape[1] == C and x.shape[2] == L
        M = N * L
        # Layout plumbing only: NCL -> (N*L, C) rows, channels on lanes.
        x2d = jnp.transpose(x, (0, 2, 1)).reshape(M, C)
        return pl.pallas_call(
            kernel,
            out_shape=jax.ShapeDtypeStruct((N, OUT), jnp.float32),
            in_specs=[pl.BlockSpec(memory_space=pltpu.MemorySpace.VMEM),
                      pl.BlockSpec(memory_space=pltpu.MemorySpace.VMEM)],
            out_specs=pl.BlockSpec(memory_space=pltpu.MemorySpace.VMEM),
            scratch_shapes=[pltpu.VMEM((M, HC), jnp.float32),      # conv_3 rows
                            pltpu.VMEM((M // 2, 2), jnp.float32)], # conv_1 rows
        )(x2d, pslab)

    return forward


# ----------------------------------------------------------------------------
# Plain-JAX reference (same eval-mode semantics) for a sanity check.
# ----------------------------------------------------------------------------
def reference(x, s0, t0, w3, b3, w1c, b1c, s1, t1, wl1, bl1,
              s2, t2, wl2, bl2, s3, t3, wl3, bl3, wl4, bl4):
    N, C, L = x.shape
    L1 = L - 2
    T1 = (L1 - 3) // 2 + 1
    T2 = (T1 - 2) // 2 + 1
    xb = x * s0.reshape(1, C, 1) + t0.reshape(1, C, 1)
    y1 = sum(jnp.einsum('ncl,hc->nhl', xb[:, :, k:k + L1], w3[:, :, k])
             for k in range(3)) + b3.reshape(1, -1, 1)
    y1 = _elu(y1)
    p1 = jnp.stack([jnp.max(y1[:, :, 2 * t:2 * t + 3], axis=-1)
                    for t in range(T1)], axis=-1)
    y2 = _elu(jnp.einsum('nhl,oh->nol', p1, w1c[:, :, 0])
              + b1c.reshape(1, -1, 1))
    p2 = jnp.stack([jnp.max(y2[:, :, 2 * t:2 * t + 2], axis=-1)
                    for t in range(T2)], axis=-1)
    f = p2.reshape(N, -1)
    h = _elu((f * s1 + t1) @ wl1.T + bl1)
    h = _elu((h * s2 + t2) @ wl2.T + bl2)
    h = _elu((h * s3 + t3) @ wl3.T + bl3)
    return h @ wl4.T + bl4


if __name__ == "__main__":
    # Small config consistent with the module's constructor.
    input_size, hidden_size, output_size = 32, 32, 4
    in_channels, hidden_channels, audio_num = 9, 16, 1
    batch = 4

    C_in = in_channels + audio_num
    L = input_size
    fc_in = ((input_size - 2) // 2 - 1) // 2
    F_in = 2 * fc_in
    H2 = 2 * hidden_size

    key = jax.random.PRNGKey(0)
    ks = jax.random.split(key, 20)

    def nrm(k, shape, s=0.1):
        return s * jax.random.normal(k, shape, jnp.float32)

    x = nrm(ks[0], (batch, C_in, L), 1.0)             # PyTorch NCL input

    def bn_params(k, n):
        k1, k2, k3, k4 = jax.random.split(k, 4)
        gamma = 1.0 + 0.1 * jax.random.normal(k1, (n,), jnp.float32)
        beta = 0.1 * jax.random.normal(k2, (n,), jnp.float32)
        rmean = 0.1 * jax.random.normal(k3, (n,), jnp.float32)
        rvar = 1.0 + 0.5 * jax.random.uniform(k4, (n,), jnp.float32)
        scale = gamma / jnp.sqrt(rvar + 1e-5)
        shift = beta - rmean * scale
        return scale.reshape(1, n), shift.reshape(1, n)

    s0, t0 = bn_params(ks[1], C_in)
    s1, t1 = bn_params(ks[2], F_in)
    s2, t2 = bn_params(ks[3], H2)
    s3, t3 = bn_params(ks[4], H2)

    w3 = nrm(ks[5], (hidden_channels, C_in, 3))       # Conv1d weight (O, I, K)
    b3 = nrm(ks[6], (hidden_channels,))
    w1c = nrm(ks[7], (2, hidden_channels, 1))
    b1c = nrm(ks[8], (2,))
    wl1 = nrm(ks[9], (H2, F_in)); bl1 = nrm(ks[10], (H2,))
    wl2 = nrm(ks[11], (H2, H2)); bl2 = nrm(ks[12], (H2,))
    wl3 = nrm(ks[13], (hidden_size, H2)); bl3 = nrm(ks[14], (hidden_size,))
    wl4 = nrm(ks[15], (output_size, hidden_size)); bl4 = nrm(ks[16], (output_size,))

    slab, meta = fold_params(w3, b3, w1c, b1c, s0, t0, s1, t1, wl1, bl1,
                             s2, t2, wl2, bl2, s3, t3, wl3, bl3, wl4, bl4,
                             input_size=input_size)

    forward = jax.jit(make_forward(meta))
    out = jax.block_until_ready(forward(x, slab))

    ref = reference(x, s0, t0, w3, b3, w1c, b1c, s1, t1, wl1, bl1,
                    s2, t2, wl2, bl2, s3, t3, wl3, bl3, wl4, bl4)
    if not bool(jnp.allclose(out, ref, atol=5e-4, rtol=5e-4)):
        err = float(jnp.max(jnp.abs(out - ref)))
        raise AssertionError(
            f"Pallas output does not match JAX reference (max err {err:.3e})")

    print("KERNEL_OK")
</pallas_src>

<mosaic_0001>
module attributes {stable_mosaic.version = 11 : i64} {
  func.func @fused_nn_kernel(%arg0: memref<128x10xf32, #tpu.memory_space<vmem>>, %arg1: memref<288x64xf32, #tpu.memory_space<vmem>>, %arg2: memref<4x4xf32, #tpu.memory_space<vmem>>, %arg3: memref<128x16xf32, #tpu.memory_space<vmem>>, %arg4: memref<64x2xf32, #tpu.memory_space<vmem>>) attributes {dimension_semantics = [], scalar_prefetch = 0 : i64, scratch_operands = 2 : i64, tpu.core_type = #tpu.core_type<tc>} {
    %c0 = arith.constant 0 : index
    %c0_0 = arith.constant 0 : index
    %0 = vector.load %arg0[%c0, %c0_0] : memref<128x10xf32, #tpu.memory_space<vmem>>, vector<128x10xf32>
    %c0_1 = arith.constant 0 : index
    %c0_2 = arith.constant 0 : index
    %1 = vector.load %arg1[%c0_1, %c0_2] : memref<288x64xf32, #tpu.memory_space<vmem>>, vector<10x16xf32>
    %cst = arith.constant dense<0.000000e+00> : vector<128x16xf32>
    %2 = tpu.matmul %0, %1, %cst {dimension_numbers = #tpu.dot_dimension_numbers<[1], [0], [0], [1], [0, 0, 1, 1], [], []>} : vector<128x10xf32>, vector<10x16xf32>, vector<128x16xf32> -> vector<128x16xf32>
    %3 = vector.extract_strided_slice %0 {offsets = [1, 0], sizes = [127, 10], strides = [1, 1]} : vector<128x10xf32> to vector<127x10xf32>
    %4 = vector.extract_strided_slice %0 {offsets = [0, 0], sizes = [1, 10], strides = [1, 1]} : vector<128x10xf32> to vector<1x10xf32>
    %5 = tpu.concatenate %3, %4 in 0 : vector<127x10xf32>, vector<1x10xf32> -> vector<128x10xf32>
    %c16 = arith.constant 16 : index
    %c0_3 = arith.constant 0 : index
    %6 = vector.load %arg1[%c16, %c0_3] : memref<288x64xf32, #tpu.memory_space<vmem>>, vector<10x16xf32>
    %cst_4 = arith.constant dense<0.000000e+00> : vector<128x16xf32>
    %7 = tpu.matmul %5, %6, %cst_4 {dimension_numbers = #tpu.dot_dimension_numbers<[1], [0], [0], [1], [0, 0, 1, 1], [], []>} : vector<128x10xf32>, vector<10x16xf32>, vector<128x16xf32> -> vector<128x16xf32>
    %8 = arith.addf %2, %7 : vector<128x16xf32>
    %9 = vector.extract_strided_slice %0 {offsets = [2, 0], sizes = [126, 10], strides = [1, 1]} : vector<128x10xf32> to vector<126x10xf32>
    %10 = vector.extract_strided_slice %0 {offsets = [0, 0], sizes = [2, 10], strides = [1, 1]} : vector<128x10xf32> to vector<2x10xf32>
    %11 = tpu.concatenate %9, %10 in 0 : vector<126x10xf32>, vector<2x10xf32> -> vector<128x10xf32>
    %c32 = arith.constant 32 : index
    %c0_5 = arith.constant 0 : index
    %12 = vector.load %arg1[%c32, %c0_5] : memref<288x64xf32, #tpu.memory_space<vmem>>, vector<10x16xf32>
    %cst_6 = arith.constant dense<0.000000e+00> : vector<128x16xf32>
    %13 = tpu.matmul %11, %12, %cst_6 {dimension_numbers = #tpu.dot_dimension_numbers<[1], [0], [0], [1], [0, 0, 1, 1], [], []>} : vector<128x10xf32>, vector<10x16xf32>, vector<128x16xf32> -> vector<128x16xf32>
    %14 = arith.addf %8, %13 : vector<128x16xf32>
    %c48 = arith.constant 48 : index
    %c0_7 = arith.constant 0 : index
    %15 = vector.load %arg1[%c48, %c0_7] : memref<288x64xf32, #tpu.memory_space<vmem>>, vector<1x16xf32>
    %16 = vector.broadcast %15 : vector<1x16xf32> to vector<128x16xf32>
    %17 = arith.addf %14, %16 : vector<128x16xf32>
    %c0_8 = arith.constant 0 : index
    %c0_9 = arith.constant 0 : index
    %18 = vector.load %arg3[%c0_8, %c0_9] : memref<128x16xf32, #tpu.memory_space<vmem>>, vector<128x16xf32>
    tpu.vector_store %arg3[%c0_8, %c0_9], %17 {strides = array<i32>} : memref<128x16xf32, #tpu.memory_space<vmem>>, vector<128x16xf32>,
    %c0_10 = arith.constant 0 : index
    %c0_11 = arith.constant 0 : index
    %19 = tpu.strided_load %arg3[%c0_10, %c0_11] {strides = array<i32: 2, 1>} : memref<128x16xf32, #tpu.memory_space<vmem>>, vector<64x16xf32>
    %c1 = arith.constant 1 : index
    %c0_12 = arith.constant 0 : index
    %20 = tpu.strided_load %arg3[%c1, %c0_12] {strides = array<i32: 2, 1>} : memref<128x16xf32, #tpu.memory_space<vmem>>, vector<64x16xf32>
    %21 = arith.maximumf %19, %20 : vector<64x16xf32>
    %22 = vector.extract_strided_slice %19 {offsets = [1, 0], sizes = [63, 16], strides = [1, 1]} : vector<64x16xf32> to vector<63x16xf32>
    %23 = vector.extract_strided_slice %19 {offsets = [0, 0], sizes = [1, 16], strides = [1, 1]} : vector<64x16xf32> to vector<1x16xf32>
    %24 = tpu.concatenate %22, %23 in 0 : vector<63x16xf32>, vector<1x16xf32> -> vector<64x16xf32>
    %25 = arith.maximumf %21, %24 : vector<64x16xf32>
    %cst_13 = arith.constant 0.000000e+00 : f32
    %26 = vector.broadcast %cst_13 : f32 to vector<64x16xf32>
    %27 = arith.cmpf ogt, %25, %26 : vector<64x16xf32>
    %cst_14 = arith.constant 0.000000e+00 : f32
    %28 = vector.broadcast %cst_14 : f32 to vector<64x16xf32>
    %29 = arith.minimumf %25, %28 : vector<64x16xf32>
    %30 = math.exp %29 : vector<64x16xf32>
    %cst_15 = arith.constant 1.000000e+00 : f32
    %31 = vector.broadcast %cst_15 : f32 to vector<64x16xf32>
    %32 = arith.subf %30, %31 : vector<64x16xf32>
    %33 = arith.select %27, %25, %32 : vector<64x16xi1>, vector<64x16xf32>
    %c56 = arith.constant 56 : index
    %c0_16 = arith.constant 0 : index
    %34 = vector.load %arg1[%c56, %c0_16] : memref<288x64xf32, #tpu.memory_space<vmem>>, vector<16x2xf32>
    %cst_17 = arith.constant dense<0.000000e+00> : vector<64x2xf32>
    %35 = tpu.matmul %33, %34, %cst_17 {dimension_numbers = #tpu.dot_dimension_numbers<[1], [0], [0], [1], [0, 0, 1, 1], [], []>} : vector<64x16xf32>, vector<16x2xf32>, vector<64x2xf32> -> vector<64x2xf32>
    %c72 = arith.constant 72 : index
    %c0_18 = arith.constant 0 : index
    %36 = vector.load %arg1[%c72, %c0_18] : memref<288x64xf32, #tpu.memory_space<vmem>>, vector<1x2xf32>
    %37 = vector.broadcast %36 : vector<1x2xf32> to vector<64x2xf32>
    %38 = arith.addf %35, %37 : vector<64x2xf32>
    %c0_19 = arith.constant 0 : index
    %c0_20 = arith.constant 0 : index
    %39 = vector.load %arg4[%c0_19, %c0_20] : memref<64x2xf32, #tpu.memory_space<vmem>>, vector<64x2xf32>
    tpu.vector_store %arg4[%c0_19, %c0_20], %38 {strides = array<i32>} : memref<64x2xf32, #tpu.memory_space<vmem>>, vector<64x2xf32>,
    %c0_21 = arith.constant 0 : index
    %c0_22 = arith.constant 0 : index
    %40 = tpu.strided_load %arg4[%c0_21, %c0_22] {strides = array<i32: 2, 1>} : memref<64x2xf32, #tpu.memory_space<vmem>>, vector<32x2xf32>
    %c1_23 = arith.constant 1 : index
    %c0_24 = arith.constant 0 : index
    %41 = tpu.strided_load %arg4[%c1_23, %c0_24] {strides = array<i32: 2, 1>} : memref<64x2xf32, #tpu.memory_space<vmem>>, vector<32x2xf32>
    %42 = arith.maximumf %40, %41 : vector<32x2xf32>
    %cst_25 = arith.constant 0.000000e+00 : f32
    %43 = vector.broadcast %cst_25 : f32 to vector<32x2xf32>
    %44 = arith.cmpf ogt, %42, %43 : vector<32x2xf32>
    %cst_26 = arith.constant 0.000000e+00 : f32
    %45 = vector.broadcast %cst_26 : f32 to vector<32x2xf32>
    %46 = arith.minimumf %42, %45 : vector<32x2xf32>
    %47 = math.exp %46 : vector<32x2xf32>
    %cst_27 = arith.constant 1.000000e+00 : f32
    %48 = vector.broadcast %cst_27 : f32 to vector<32x2xf32>
    %49 = arith.subf %47, %48 : vector<32x2xf32>
    %50 = arith.select %44, %42, %49 : vector<32x2xi1>, vector<32x2xf32>
    %51 = vector.shape_cast %50 : vector<32x2xf32> to vector<4x8x2xf32>
    %52 = vector.extract_strided_slice %51 {offsets = [0, 0, 0], sizes = [4, 8, 1], strides = [1, 1, 1]} : vector<4x8x2xf32> to vector<4x8x1xf32>
    %c80 = arith.constant 80 : index
    %c0_28 = arith.constant 0 : index
    %53 = vector.load %arg1[%c80, %c0_28] : memref<288x64xf32, #tpu.memory_space<vmem>>, vector<8x64xf32>
    %54 = vector.shape_cast %53 : vector<8x64xf32> to vector<1x8x64xf32>
    %55 = vector.broadcast %52 : vector<4x8x1xf32> to vector<4x8x64xf32>
    %56 = vector.broadcast %54 : vector<1x8x64xf32> to vector<4x8x64xf32>
    %57 = arith.mulf %55, %56 : vector<4x8x64xf32>
    %58 = vector.extract_strided_slice %51 {offsets = [0, 0, 1], sizes = [4, 8, 1], strides = [1, 1, 1]} : vector<4x8x2xf32> to vector<4x8x1xf32>
    %c88 = arith.constant 88 : index
    %c0_29 = arith.constant 0 : index
    %59 = vector.load %arg1[%c88, %c0_29] : memref<288x64xf32, #tpu.memory_space<vmem>>, vector<8x64xf32>
    %60 = vector.shape_cast %59 : vector<8x64xf32> to vector<1x8x64xf32>
    %61 = vector.broadcast %58 : vector<4x8x1xf32> to vector<4x8x64xf32>
    %62 = vector.broadcast %60 : vector<1x8x64xf32> to vector<4x8x64xf32>
    %63 = arith.mulf %61, %62 : vector<4x8x64xf32>
    %64 = arith.addf %57, %63 : vector<4x8x64xf32>
    %cst_30 = arith.constant dense<0.000000e+00> : vector<4x64xf32>
    %65 = vector.multi_reduction <add>, %64, %cst_30 [1] : vector<4x8x64xf32> to vector<4x64xf32>
    %c96 = arith.constant 96 : index
    %c0_31 = arith.constant 0 : index
    %66 = vector.load %arg1[%c96, %c0_31] : memref<288x64xf32, #tpu.memory_space<vmem>>, vector<1x64xf32>
    %67 = vector.broadcast %66 : vector<1x64xf32> to vector<4x64xf32>
    %68 = arith.addf %65, %67 : vector<4x64xf32>
    %cst_32 = arith.constant 0.000000e+00 : f32
    %69 = vector.broadcast %cst_32 : f32 to vector<4x64xf32>
    %70 = arith.cmpf ogt, %68, %69 : vector<4x64xf32>
    %cst_33 = arith.constant 0.000000e+00 : f32
    %71 = vector.broadcast %cst_33 : f32 to vector<4x64xf32>
    %72 = arith.minimumf %68, %71 : vector<4x64xf32>
    %73 = math.exp %72 : vector<4x64xf32>
    %cst_34 = arith.constant 1.000000e+00 : f32
    %74 = vector.broadcast %cst_34 : f32 to vector<4x64xf32>
    %75 = arith.subf %73, %74 : vector<4x64xf32>
    %76 = arith.select %70, %68, %75 : vector<4x64xi1>, vector<4x64xf32>
    %c104 = arith.constant 104 : index
    %c0_35 = arith.constant 0 : index
    %77 = vector.load %arg1[%c104, %c0_35] : memref<288x64xf32, #tpu.memory_space<vmem>>, vector<64x64xf32>
    %cst_36 = arith.constant dense<0.000000e+00> : vector<4x64xf32>
    %78 = tpu.matmul %76, %77, %cst_36 {dimension_numbers = #tpu.dot_dimension_numbers<[1], [0], [0], [1], [0, 0, 1, 1], [], []>} : vector<4x64xf32>, vector<64x64xf32>, vector<4x64xf32> -> vector<4x64xf32>
    %c168 = arith.constant 168 : index
    %c0_37 = arith.constant 0 : index
    %79 = vector.load %arg1[%c168, %c0_37] : memref<288x64xf32, #tpu.memory_space<vmem>>, vector<1x64xf32>
    %80 = vector.broadcast %79 : vector<1x64xf32> to vector<4x64xf32>
    %81 = arith.addf %78, %80 : vector<4x64xf32>
    %cst_38 = arith.constant 0.000000e+00 : f32
    %82 = vector.broadcast %cst_38 : f32 to vector<4x64xf32>
    %83 = arith.cmpf ogt, %81, %82 : vector<4x64xf32>
    %cst_39 = arith.constant 0.000000e+00 : f32
    %84 = vector.broadcast %cst_39 : f32 to vector<4x64xf32>
    %85 = arith.minimumf %81, %84 : vector<4x64xf32>
    %86 = math.exp %85 : vector<4x64xf32>
    %cst_40 = arith.constant 1.000000e+00 : f32
    %87 = vector.broadcast %cst_40 : f32 to vector<4x64xf32>
    %88 = arith.subf %86, %87 : vector<4x64xf32>
    %89 = arith.select %83, %81, %88 : vector<4x64xi1>, vector<4x64xf32>
    %c176 = arith.constant 176 : index
    %c0_41 = arith.constant 0 : index
    %90 = vector.load %arg1[%c176, %c0_41] : memref<288x64xf32, #tpu.memory_space<vmem>>, vector<64x32xf32>
    %cst_42 = arith.constant dense<0.000000e+00> : vector<4x32xf32>
    %91 = tpu.matmul %89, %90, %cst_42 {dimension_numbers = #tpu.dot_dimension_numbers<[1], [0], [0], [1], [0, 0, 1, 1], [], []>} : vector<4x64xf32>, vector<64x32xf32>, vector<4x32xf32> -> vector<4x32xf32>
    %c240 = arith.constant 240 : index
    %c0_43 = arith.constant 0 : index
    %92 = vector.load %arg1[%c240, %c0_43] : memref<288x64xf32, #tpu.memory_space<vmem>>, vector<1x32xf32>
    %93 = vector.broadcast %92 : vector<1x32xf32> to vector<4x32xf32>
    %94 = arith.addf %91, %93 : vector<4x32xf32>
    %cst_44 = arith.constant 0.000000e+00 : f32
    %95 = vector.broadcast %cst_44 : f32 to vector<4x32xf32>
    %96 = arith.cmpf ogt, %94, %95 : vector<4x32xf32>
    %cst_45 = arith.constant 0.000000e+00 : f32
    %97 = vector.broadcast %cst_45 : f32 to vector<4x32xf32>
    %98 = arith.minimumf %94, %97 : vector<4x32xf32>
    %99 = math.exp %98 : vector<4x32xf32>
    %cst_46 = arith.constant 1.000000e+00 : f32
    %100 = vector.broadcast %cst_46 : f32 to vector<4x32xf32>
    %101 = arith.subf %99, %100 : vector<4x32xf32>
    %102 = arith.select %96, %94, %101 : vector<4x32xi1>, vector<4x32xf32>
    %c248 = arith.constant 248 : index
    %c0_47 = arith.constant 0 : index
    %103 = vector.load %arg1[%c248, %c0_47] : memref<288x64xf32, #tpu.memory_space<vmem>>, vector<32x4xf32>
    %cst_48 = arith.constant dense<0.000000e+00> : vector<4x4xf32>
    %104 = tpu.matmul %102, %103, %cst_48 {dimension_numbers = #tpu.dot_dimension_numbers<[1], [0], [0], [1], [0, 0, 1, 1], [], []>} : vector<4x32xf32>, vector<32x4xf32>, vector<4x4xf32> -> vector<4x4xf32>
    %c280 = arith.constant 280 : index
    %c0_49 = arith.constant 0 : index
    %105 = vector.load %arg1[%c280, %c0_49] : memref<288x64xf32, #tpu.memory_space<vmem>>, vector<1x4xf32>
    %106 = vector.broadcast %105 : vector<1x4xf32> to vector<4x4xf32>
    %107 = arith.addf %104, %106 : vector<4x4xf32>
    %c0_50 = arith.constant 0 : index
    %c0_51 = arith.constant 0 : index
    %108 = vector.load %arg2[%c0_50, %c0_51] : memref<4x4xf32, #tpu.memory_space<vmem>>, vector<4x4xf32>
    tpu.vector_store %arg2[%c0_50, %c0_51], %107 {strides = array<i32>} : memref<4x4xf32, #tpu.memory_space<vmem>>, vector<4x4xf32>,
    return
  }
}

</mosaic_0001>

<bundles_post_ra>
// kernel: forward.1
= control target key start
LH: loop header
LB: loop body
LE: loop exit
PB: predicated region body
PF: predicated region fallthrough
CT: control target
= control target key end

     0   :  { %vm117_vm0 = vcmask 1041408   ;;  %vm1922_vm1 = vmmov 1   ;;  %vm46_vm3 = vcmask 1046528   ;;  %vm83_vm4 = vcmask 80896   ;;  %s2409_s0 = inlined_call_operand.vmem [shape: f32[128,10], index: 0, kind: input, shape index: {}]   ;;  %s2410_s1 = inlined_call_operand.vmem [shape: f32[288,64], index: 1, kind: input, shape index: {}]   ;;  %s2411_s2 = inlined_call_operand.hbm [shape: f32[4,4], index: 2, kind: output, shape index: {}]  }
   0x1   :  { %v81_v0 = vld [vmem:[%s2410_s1 + $0x10] sm:$0xff]  ;;  %v82_v1 = vld [vmem:[%s2410_s1 + $0x18] sm:$0x3]  ;;  %v1953_v2 = vld [vmem:[%s2409_s0] sm:$0xff] }
   0x2   :  { %v1763_v3 = vpack.c.bf16 %v82_v1, %v81_v0  ;;  %vm1955_vm2 = vmpackc.low %vm117_vm0, %vm1922_vm1  ;;  %v1962_v5 = vld [vmem:[%s2409_s0 + $0x8] sm:$0xff]  ;;  %v47_v6 = vrot.slane %v1953_v2, 1  ;;  %v1968_v7 = vld [vmem:[%s2409_s0 + $0x10] sm:$0xff] }
   0x3   :  { %v48_v8 = vrot.slane %v1962_v5, 1  ;;  %v50_v9 = vrot.slane %v1968_v7, 1  ;;  %v28_v10 = vld [vmem:[%s2410_s1] sm:$0xff]  ;;  %v29_v11 = vld [vmem:[%s2410_s1 + $0x8] sm:$0x3]  ;;  %v2020_v21 = vld [vmem:[%s2409_s0 + $0x18] sm:$0xff] }
   0x4   :  { %1765 = vmatprep.subr.msk.bf16.mxu0 %vm1955_vm2, %v1763_v3  ;;  %v1769_v12 = vpack.c.bf16 %v29_v11, %v28_v10  ;;  %v481_v13 = vld [vmem:[%s2410_s1 + $0x20] sm:$0xff]  ;;  %v482_v14 = vld [vmem:[%s2410_s1 + $0x28] sm:$0x3]  ;;  %1815 = vmatprep.subr.msk.bf16.mxu1 %vm1955_vm2, %v1763_v3 }
   0x5   :  { %1768 = vmatpush3.bf16.msk.msra.mxu0 %vm1955_vm2, %v1763_v3  ;;  %v49_v15 = vsel %vm46_vm3, %v47_v6, %v48_v8  ;;  %v51_v16 = vsel %vm46_vm3, %v48_v8, %v50_v9  ;;  %1816 = vmatpush3.bf16.msk.msra.mxu1 %vm1955_vm2, %v1763_v3  ;;  %v1775_v17 = vpack.c.bf16 %v482_v14, %v481_v13  ;;  %v2007_v18 = vld [vmem:[%s2409_s0 + $0x20] sm:$0xff]  ;;  %v2015_v20 = vld [vmem:[%s2409_s0 + $0x28] sm:$0xff] }
   0x6   :  { %1618 = vmatprep.mubr.msk.f32.mxu0 %vm83_vm4, %v49_v15  ;;  %1771 = vmatprep.subr.msk.bf16.mxu0 %vm1955_vm2, %v1769_v12  ;;  %v54_v19 = vrot.slane %v2007_v18, 1  ;;  %v56_v22 = vrot.slane %v2015_v20, 1 }
   0x8   :  { %1619 = vmatmul.mubr.msk.f32.vlgmr.msra.gmra.mrb[0].mxu0 %vm83_vm4, %v51_v16 }
   0x9   :  { %1774 = vmatpush3.bf16.msk.msra.mxu0 %vm1955_vm2, %v1769_v12  ;;  %1646 = vmatprep.mubr.msk.f32.mxu0 %vm83_vm4, %v1953_v2 }
   0xa   :  { %1777 = vmatprep.subr.msk.bf16.mxu0 %vm1955_vm2, %v1775_v17 }
   0xb   :  { %7 = vsyncpa [#allocation5], 0  ;;  %v2026_v23 = vld [vmem:[%s2409_s0 + $0x30] sm:$0xff]  ;;  %v52_v24 = vrot.slane %v2020_v21, 1  ;;  %v2033_v26 = vld [vmem:[%s2409_s0 + $0x38] sm:$0xff]  ;;  %v57_v30 = vsel %vm46_vm3, %v54_v19, %v56_v22  ;;  %v447_v58 = vrot.slane %v1953_v2, 2 }
   0xc   :  { %v58_v25 = vrot.slane %v2026_v23, 1  ;;  %v60_v27 = vrot.slane %v2033_v26, 1  ;;  %v2045_v31 = vld [vmem:[%s2409_s0 + $0x40] sm:$0xff]  ;;  %v2056_v33 = vld [vmem:[%s2409_s0 + $0x48] sm:$0xff]  ;;  %v2067_v37 = vld [vmem:[%s2409_s0 + $0x50] sm:$0xff]  ;;  %v448_v59 = vrot.slane %v1962_v5, 2 }
   0xd   :  { %v53_v28 = vsel %vm46_vm3, %v50_v9, %v52_v24  ;;  %v55_v29 = vsel %vm46_vm3, %v52_v24, %v54_v19  ;;  %v62_v32 = vrot.slane %v2045_v31, 1  ;;  %v64_v35 = vrot.slane %v2056_v33, 1  ;;  %v2076_v39 = vld [vmem:[%s2409_s0 + $0x58] sm:$0xff]  ;;  %v2087_v43 = vld [vmem:[%s2409_s0 + $0x60] sm:$0xff]  ;;  %v2096_v45 = vld [vmem:[%s2409_s0 + $0x68] sm:$0xff]  ;;  %s1928_s26 = smov [#allocation4]  }
   0xe   :  { %1621 = vmatprep.mubr.msk.f32.mxu1 %vm83_vm4, %v53_v28  ;;  %v59_v34 = vsel %vm46_vm3, %v56_v22, %v58_v25  ;;  %v61_v36 = vsel %vm46_vm3, %v58_v25, %v60_v27  ;;  %v66_v38 = vrot.slane %v2067_v37, 1  ;;  %v68_v41 = vrot.slane %v2076_v39, 1  ;;  %v2107_v49 = vld [vmem:[%s2409_s0 + $0x70] sm:$0xff]  ;;  %v2116_v51 = vld [vmem:[%s2409_s0 + $0x78] sm:$0xff]  ;;  %s1433_s27 = sshll.u32 %s1928_s26, 4  ;;  %s1434_s27 = int_to_ptr.vmem [resolvable:$true] %s1433_s27 }
   0xf   :  { %1622 = vmatmul.mubr.msk.f32.vlgmr.msra.gmra.mrb[0].mxu1 %vm83_vm4, %v55_v29  ;;  %v63_v40 = vsel %vm46_vm3, %v60_v27, %v62_v32  ;;  %v65_v42 = vsel %vm46_vm3, %v62_v32, %v64_v35  ;;  %v70_v44 = vrot.slane %v2087_v43, 1  ;;  %v72_v47 = vrot.slane %v2096_v45, 1  ;;  %v847_v27 = vld [vmem:[%s2410_s1 + $0x40] sm:$0xff]  ;;  %s1898_s28 = scalar_lea.vmem %s1434_s27, 64  ;;  %p1903_p1 = scmp.lt.s32.totalorder %s1434_s27, %s1434_s27 }
  0x10   :  { %1647 = vmatmul.mubr.msk.f32.vlgmr.msra.gmra.mrb[0].mxu0 %vm83_vm4, %v1962_v5  ;;  %1624 = vmatprep.mubr.msk.f32.mxu1 %vm83_vm4, %v57_v30  ;;  %v67_v46 = vsel %vm46_vm3, %v64_v35, %v66_v38  ;;  %v69_v48 = vsel %vm46_vm3, %v66_v38, %v68_v41  ;;  %v74_v50 = vrot.slane %v2107_v49, 1  ;;  %v76_v53 = vrot.slane %v2116_v51, 1  ;;  %p1899_p0 = scmp.ne.s32.totalorder %s1434_s27, %s1898_s28  ;;  %p1904_p2 = scmp.lt.s32.totalorder %s1898_s28, %s1898_s28 }
  0x11   :  { %1780 = vmatpush3.bf16.msk.msra.mxu0 %vm1955_vm2, %v1775_v17  ;;  %1649 = vmatprep.mubr.msk.f32.mxu0 %vm83_vm4, %v1968_v7  ;;  %v71_v52 = vsel %vm46_vm3, %v68_v41, %v70_v44  ;;  %v73_v54 = vsel %vm46_vm3, %v70_v44, %v72_v47  ;;  %vm446_vm5 = vcmask 1045504   ;;  %v450_v60 = vrot.slane %v1968_v7, 2 }
  0x12   :  { %v75_v55 = vsel %vm46_vm3, %v72_v47, %v74_v50  ;;  %v77_v56 = vsel %vm46_vm3, %v74_v50, %v76_v53  ;;  %v80_v57 = vsel %vm46_vm3, %v76_v53, %v47_v6  ;;  %v452_v61 = vrot.slane %v2020_v21, 2  ;;  %p1905_p3 = por %p1904_p2, %p1903_p1 }
  0x13   :  { %1625 = vmatmul.mubr.msk.f32.gmra.mrb[2].mxu1 %vm83_vm4, %v59_v34  ;;  %v449_v62 = vsel %vm446_vm5, %v447_v58, %v448_v59  ;;  %v454_v63 = vrot.slane %v2007_v18, 2  ;;  %v451_v0 = vsel %vm446_vm5, %v448_v59, %v450_v60  ;;  %v456_v1 = vrot.slane %v2015_v20, 2 }
  0x14   :  { %1650 = vmatmul.mubr.msk.f32.gmra.mrb[2].mxu0 %vm83_vm4, %v2020_v21  ;;  %1627 = vmatprep.mubr.msk.f32.mxu1 %vm83_vm4, %v61_v36  ;;  %v453_v2 = vsel %vm446_vm5, %v450_v60, %v452_v61  ;;  %v458_v3 = vrot.slane %v2026_v23, 2  ;;  %v460_v5 = vrot.slane %v2033_v26, 2  ;;  %v462_v7 = vrot.slane %v2045_v31, 2  ;;  %p1906_p4 = pnand %p1905_p3, %p1899_p0 }
  0x15   :  { %1652 = vmatprep.mubr.msk.f32.mxu0 %vm83_vm4, %v2007_v18  ;;  %v455_v4 = vsel %vm446_vm5, %v452_v61, %v454_v63  ;;  %v457_v6 = vsel %vm446_vm5, %v454_v63, %v456_v1  ;;  %v464_v9 = vrot.slane %v2056_v33, 2  ;;  %v466_v11 = vrot.slane %v2067_v37, 2 }
  0x16   :  { %v459_v8 = vsel %vm446_vm5, %v456_v1, %v458_v3  ;;  %v461_v10 = vsel %vm446_vm5, %v458_v3, %v460_v5  ;;  %v463_v12 = vsel %vm446_vm5, %v460_v5, %v462_v7  ;;  %v468_v13 = vrot.slane %v2076_v39, 2 }
  0x17   :  { %1628 = vmatmul.mubr.msk.f32.gmra.mrb[4].mxu1 %vm83_vm4, %v63_v40  ;;  %v465_v14 = vsel %vm446_vm5, %v462_v7, %v464_v9  ;;  %v470_v15 = vrot.slane %v2087_v43, 2  ;;  %v467_v16 = vsel %vm446_vm5, %v464_v9, %v466_v11  ;;  %v472_v17 = vrot.slane %v2096_v45, 2 }
  0x18   :  { %1653 = vmatmul.mubr.msk.f32.gmra.mrb[4].mxu0 %vm83_vm4, %v2015_v20  ;;  %1630 = vmatprep.mubr.msk.f32.mxu1 %vm83_vm4, %v65_v42  ;;  %v469_v18 = vsel %vm446_vm5, %v466_v11, %v468_v13  ;;  %v474_v19 = vrot.slane %v2107_v49, 2  ;;  %v476_v21 = vrot.slane %v2116_v51, 2  ;;  %vm701_vm6 = vcmask 130048  }
  0x19   :  { %1655 = vmatprep.mubr.msk.f32.mxu0 %vm83_vm4, %v2026_v23  ;;  %v471_v20 = vsel %vm446_vm5, %v468_v13, %v470_v15  ;;  %v473_v22 = vsel %vm446_vm5, %v470_v15, %v472_v17  ;;  %vm982_vm15 = vcmask 15360  }
  0x1a   :  { %v475_v23 = vsel %vm446_vm5, %v472_v17, %v474_v19  ;;  %v477_v24 = vsel %vm446_vm5, %v474_v19, %v476_v21  ;;  %v480_v25 = vsel %vm446_vm5, %v476_v21, %v447_v58  ;;  %vm1084_vm5 = vcmask 523264  }
  0x1b   :  { %1631 = vmatmul.mubr.msk.f32.gmra.mrb[6].mxu1 %vm83_vm4, %v67_v46 }
  0x1c   :  { %1656 = vmatmul.mubr.msk.f32.gmra.mrb[6].mxu0 %vm83_vm4, %v2033_v26  ;;  %1633 = vmatprep.mubr.msk.f32.mxu1 %vm83_vm4, %v69_v48  ;;  %v846_v26 = vld [vmem:[%s2410_s1 + $0x38] sm:$0xff] }
  0x1d   :  { %1658 = vmatprep.mubr.msk.f32.mxu0 %vm83_vm4, %v2045_v31  ;;  %v1781_v28 = vpack.c.bf16 %v847_v27, %v846_v26 }
  0x1f   :  { %1634 = vmatmul.mubr.msk.f32.gmra.mrb[8].mxu1 %vm83_vm4, %v71_v52  ;;  %1782 = vmatprep.subr.bf16.mxu1 %v1781_v28 }
  0x20   :  { %1659 = vmatmul.mubr.msk.f32.gmra.mrb[8].mxu0 %vm83_vm4, %v2056_v33  ;;  %1636 = vmatprep.mubr.msk.f32.mxu1 %vm83_vm4, %v73_v54 }
  0x21   :  { %1661 = vmatprep.mubr.msk.f32.mxu0 %vm83_vm4, %v2067_v37  ;;  %1784 = vmatpush3.bf16.msra.mxu1 %v1781_v28 }
  0x23   :  { %1637 = vmatmul.mubr.msk.f32.gmra.mrb[10].mxu1 %vm83_vm4, %v75_v55 }
  0x24   :  { %1662 = vmatmul.mubr.msk.f32.gmra.mrb[10].mxu0 %vm83_vm4, %v2076_v39  ;;  %1639 = vmatprep.mubr.msk.f32.mxu1 %vm83_vm4, %v77_v56 }
  0x25   :  { %1664 = vmatprep.mubr.msk.f32.mxu0 %vm83_vm4, %v2087_v43  ;;  %v2211_v43 = vld [vmem:[%s2410_s1 + $0x30] ss:$0 sm:$0xff] }
  0x27   :  { %1640 = vmatmul.mubr.msk.f32.gmra.mrb[12].mxu1 %vm83_vm4, %v80_v57 }
  0x28   :  { %1665 = vmatmul.mubr.msk.f32.gmra.mrb[12].mxu0 %vm83_vm4, %v2096_v45 }
  0x29   :  { %1667 = vmatprep.mubr.msk.f32.mxu0 %vm83_vm4, %v2107_v49 }
  0x2c   :  { %1668 = vmatmul.mubr.msk.f32.gmra.mrb[14].mxu0 %vm83_vm4, %v2116_v51 }
  0x2d   :  { %1674 = vmatprep.mubr.msk.f32.mxu0 %vm83_vm4, %v449_v62 }
  0x30   :  { %1675 = vmatmul.mubr.msk.f32.vlgmr.msra.gmra.mrb[0].mxu0 %vm83_vm4, %v451_v0 }
  0x31   :  { %1677 = vmatprep.mubr.msk.f32.mxu0 %vm83_vm4, %v453_v2 }
  0x34   :  { %1678 = vmatmul.mubr.msk.f32.gmra.mrb[2].mxu0 %vm83_vm4, %v455_v4 }
  0x35   :  { %1680 = vmatprep.mubr.msk.f32.mxu0 %vm83_vm4, %v457_v6 }
  0x38   :  { %1681 = vmatmul.mubr.msk.f32.gmra.mrb[4].mxu0 %vm83_vm4, %v459_v8 }
  0x39   :  { %1683 = vmatprep.mubr.msk.f32.mxu0 %vm83_vm4, %v461_v10 }
  0x3c   :  { %1684 = vmatmul.mubr.msk.f32.gmra.mrb[6].mxu0 %vm83_vm4, %v463_v12 }
  0x3d   :  { %1686 = vmatprep.mubr.msk.f32.mxu0 %vm83_vm4, %v465_v14 }
  0x40   :  { %1687 = vmatmul.mubr.msk.f32.gmra.mrb[8].mxu0 %vm83_vm4, %v467_v16 }
  0x41   :  { %1689 = vmatprep.mubr.msk.f32.mxu0 %vm83_vm4, %v469_v18 }
  0x44   :  { %1690 = vmatmul.mubr.msk.f32.gmra.mrb[10].mxu0 %vm83_vm4, %v471_v20 }
  0x45   :  { %1692 = vmatprep.mubr.msk.f32.mxu0 %vm83_vm4, %v473_v22 }
  0x48   :  { %1693 = vmatmul.mubr.msk.f32.gmra.mrb[12].mxu0 %vm83_vm4, %v475_v23 }
  0x49   :  { %1695 = vmatprep.mubr.msk.f32.mxu0 %vm83_vm4, %v477_v24 }
  0x4c   :  { %1696 = vmatmul.mubr.msk.f32.gmra.mrb[14].mxu0 %vm83_vm4, %v480_v25  ;;  %vm1926_vm4 = vmmov 0  }
  0xe2   :  { %v1623_v29 = vpop.f32.mrb[0].mxu1 }
  0xe3   :  { %v197_v30 = vpop.f32.mrb[1].mxu1 }
  0xe6   :  { %v1626_v31 = vpop.f32.mrb[2].mxu1 }
  0xe7   :  { %v207_v32 = vpop.f32.mrb[3].mxu1 }
  0xea   :  { %v1629_v33 = vpop.f32.mrb[4].mxu1 }
  0xeb   :  { %v217_v34 = vpop.f32.mrb[5].mxu1 }
  0xee   :  { %v1632_v35 = vpop.f32.mrb[6].mxu1 }
  0xef   :  { %v227_v36 = vpop.f32.mrb[7].mxu1 }
  0xf2   :  { %v1635_v37 = vpop.f32.mrb[8].mxu1 }
  0xf3   :  { %v237_v38 = vpop.f32.mrb[9].mxu1 }
  0xf6   :  { %v2200_v39 = vpop.f32.mrb[10].mxu1 }
  0xf7   :  { %v2202_v40 = vpop.f32.mrb[11].mxu1 }
  0xfa   :  { %v2204_v41 = vpop.f32.mrb[12].mxu1 }
  0xfb   :  { %v2206_v42 = vpop.f32.mrb[13].mxu1 }
 0x103   :  { %v1676_v44 = vpop.f32.mrb[0].mxu0 }
 0x104   :  { %v686_v45 = vadd.f32 %v1676_v44, %v2211_v43  ;;  %v585_v46 = vpop.f32.mrb[1].mxu0 }
 0x105   :  { %v685_v47 = vadd.f32 %v2211_v43, %v585_v46 }
 0x106   :  { %703 = vst.msk [vmem:[#allocation2 + $0x8] sm:$0xff] %vm701_vm6, %v686_v45 }
 0x107   :  { %702 = vst.msk [vmem:[#allocation2] sm:$0xff] %vm701_vm6, %v685_v47  ;;  %v1679_v48 = vpop.f32.mrb[2].mxu0 }
 0x108   :  { %v1817_v49 = vadd.f32 %v1679_v48, %v1623_v29  ;;  %v595_v50 = vpop.f32.mrb[3].mxu0 }
 0x109   :  { %v1818_v51 = vadd.f32 %v595_v50, %v197_v30 }
 0x10a   :  { %v688_v52 = vadd.f32 %v1817_v49, %v2211_v43 }
 0x10b   :  { %v687_v53 = vadd.f32 %v1818_v51, %v2211_v43  ;;  %v1682_v54 = vpop.f32.mrb[4].mxu0 }
 0x10c   :  { %705 = vst.msk [vmem:[#allocation2 + $0x18] sm:$0xff] %vm701_vm6, %v688_v52  ;;  %v1819_v55 = vadd.f32 %v1682_v54, %v1626_v31  ;;  %v605_v56 = vpop.f32.mrb[5].mxu0 }
 0x10d   :  { %704 = vst.msk [vmem:[#allocation2 + $0x10] sm:$0xff] %vm701_vm6, %v687_v53  ;;  %v1820_v57 = vadd.f32 %v605_v56, %v207_v32 }
 0x10e   :  { %v690_v58 = vadd.f32 %v1819_v55, %v2211_v43  ;;  %v2226_v1 = vld [vmem:[#allocation2] ss:$2 sm:$0xff]  ;;  %v734_v4 = vld [vmem:[#allocation2 + $0x1] ss:$2 sm:$0xff] }
 0x10f   :  { %v689_v59 = vadd.f32 %v1820_v57, %v2211_v43  ;;  %v1685_v60 = vpop.f32.mrb[6].mxu0  ;;  %v765_v9 = vrot.slane %v2226_v1, 1  ;;  %v749_v12 = vmax.f32 %v2226_v1, %v734_v4 }
 0x110   :  { %707 = vst.msk [vmem:[#allocation2 + $0x28] sm:$0xff] %vm701_vm6, %v690_v58  ;;  %v1821_v61 = vadd.f32 %v1685_v60, %v1629_v33  ;;  %v615_v62 = vpop.f32.mrb[7].mxu0 }
 0x111   :  { %706 = vst.msk [vmem:[#allocation2 + $0x20] sm:$0xff] %vm701_vm6, %v689_v59  ;;  %v1822_v63 = vadd.f32 %v615_v62, %v217_v34 }
 0x112   :  { %v692_v0 = vadd.f32 %v1821_v61, %v2211_v43 }
 0x113   :  { %v691_v2 = vadd.f32 %v1822_v63, %v2211_v43  ;;  %v1688_v3 = vpop.f32.mrb[8].mxu0 }
 0x114   :  { %709 = vst.msk [vmem:[#allocation2 + $0x38] sm:$0xff] %vm701_vm6, %v692_v0  ;;  %v1823_v5 = vadd.f32 %v1688_v3, %v1632_v35  ;;  %v625_v6 = vpop.f32.mrb[9].mxu0  ;;  %v720_v7 = vld [vmem:[#allocation2 + $0x10] ss:$2 sm:$0xff]  ;;  %v736_v16 = vld [vmem:[#allocation2 + $0x11] ss:$2 sm:$0xff] }
 0x115   :  { %708 = vst.msk [vmem:[#allocation2 + $0x30] sm:$0xff] %vm701_vm6, %v691_v2  ;;  %v1824_v8 = vadd.f32 %v625_v6, %v227_v36  ;;  %v766_v10 = vrot.slane %v720_v7, 1  ;;  %v750_v25 = vmax.f32 %v720_v7, %v736_v16 }
 0x116   :  { %v694_v11 = vadd.f32 %v1823_v5, %v2211_v43 }
 0x117   :  { %v693_v13 = vadd.f32 %v1824_v8, %v2211_v43  ;;  %v1691_v14 = vpop.f32.mrb[10].mxu0  ;;  %v767_v15 = vsel %vm46_vm3, %v765_v9, %v766_v10 }
 0x118   :  { %711 = vst.msk [vmem:[#allocation2 + $0x48] sm:$0xff] %vm701_vm6, %v694_v11  ;;  %v1825_v17 = vadd.f32 %v1691_v14, %v1635_v37  ;;  %v635_v18 = vpop.f32.mrb[11].mxu0  ;;  %v2239_v19 = vmax.f32 %v749_v12, %v767_v15  ;;  %v722_v20 = vld [vmem:[#allocation2 + $0x20] ss:$2 sm:$0xff]  ;;  %v738_v29 = vld [vmem:[#allocation2 + $0x21] ss:$2 sm:$0xff] }
 0x119   :  { %710 = vst.msk [vmem:[#allocation2 + $0x40] sm:$0xff] %vm701_vm6, %v693_v13  ;;  %v1826_v21 = vadd.f32 %v635_v18, %v237_v38  ;;  %v768_v22 = vrot.slane %v722_v20, 1  ;;  %v751_v44 = vmax.f32 %v722_v20, %v738_v29 }
 0x11a   :  { %v696_v23 = vadd.f32 %v1825_v17, %v2211_v43  ;;  %v806_v24 = vmin.f32 %v2239_v19, 0.0  ;;  %vm798_vm7 = vcmp.gt.f32.partialorder %v2239_v19, 0.0 }
 0x11b   :  { %v695_v26 = vadd.f32 %v1826_v21, %v2211_v43  ;;  %v1694_v27 = vpop.f32.mrb[12].mxu0  ;;  %v769_v28 = vsel %vm46_vm3, %v766_v10, %v768_v22 }
 0x11c   :  { %713 = vst.msk [vmem:[#allocation2 + $0x58] sm:$0xff] %vm701_vm6, %v696_v23  ;;  %v1827_v30 = vadd.f32 %v1694_v27, %v2200_v39  ;;  %v645_v31 = vpop.f32.mrb[13].mxu0  ;;  %v814_v32 = vmul.f32 1.442695, %v806_v24  ;;  %v2248_v33 = vmax.f32 %v750_v25, %v769_v28  ;;  %v724_v34 = vld [vmem:[#allocation2 + $0x30] ss:$2 sm:$0xff] }
 0x11d   :  { %712 = vst.msk [vmem:[#allocation2 + $0x50] sm:$0xff] %vm701_vm6, %v695_v26  ;;  %v1828_v35 = vadd.f32 %v645_v31, %v2202_v40  ;;  %v770_v36 = vrot.slane %v724_v34, 1  ;;  %v740_v47 = vld [vmem:[#allocation2 + $0x31] ss:$2 sm:$0xff] }
 0x11e   :  { %v698_v37 = vadd.f32 %v1827_v30, %v2211_v43  ;;  %1862 = vpow2.f32 %v814_v32  ;;  %v807_v38 = vmin.f32 %v2248_v33, 0.0  ;;  %v752_v56 = vmax.f32 %v724_v34, %v740_v47 }
 0x11f   :  { %v697_v45 = vadd.f32 %v1828_v35, %v2211_v43  ;;  %v1697_v46 = vpop.f32.mrb[14].mxu0  ;;  %v771_v39 = vsel %vm46_vm3, %v768_v22, %v770_v36  ;;  %vm799_vm8 = vcmp.gt.f32.partialorder %v2248_v33, 0.0 }
 0x120   :  { %715 = vst.msk [vmem:[#allocation2 + $0x68] sm:$0xff] %vm701_vm6, %v698_v37  ;;  %v1829_v48 = vadd.f32 %v1697_v46, %v2204_v41  ;;  %v655_v49 = vpop.f32.mrb[15].mxu0  ;;  %v816_v50 = vmul.f32 1.442695, %v807_v38  ;;  %v792_v40 = vmax.f32 %v751_v44, %v771_v39  ;;  %v726_v51 = vld [vmem:[#allocation2 + $0x40] ss:$2 sm:$0xff] }
 0x121   :  { %714 = vst.msk [vmem:[#allocation2 + $0x60] sm:$0xff] %vm701_vm6, %v697_v45  ;;  %v1830_v52 = vadd.f32 %v655_v49, %v2206_v42  ;;  %v772_v53 = vrot.slane %v726_v51, 1  ;;  %v742_v59 = vld [vmem:[#allocation2 + $0x41] ss:$2 sm:$0xff] }
 0x122   :  { %v700_v54 = vadd.f32 %v1829_v48, %v2211_v43  ;;  %1864 = vpow2.f32 %v816_v50  ;;  %v808_v55 = vmin.f32 %v792_v40, 0.0  ;;  %v753_v63 = vmax.f32 %v726_v51, %v742_v59 }
 0x123   :  { %v699_v57 = vadd.f32 %v1830_v52, %v2211_v43  ;;  %v773_v58 = vsel %vm46_vm3, %v770_v36, %v772_v53  ;;  %vm800_vm9 = vcmp.gt.f32.partialorder %v792_v40, 0.0 }
 0x124   :  { %717 = vst.msk [vmem:[#allocation2 + $0x78] sm:$0xff] %vm701_vm6, %v700_v54  ;;  %v818_v41 = vmul.f32 1.442695, %v808_v55  ;;  %v793_v60 = vmax.f32 %v752_v56, %v773_v58  ;;  %v728_v61 = vld [vmem:[#allocation2 + $0x50] ss:$2 sm:$0xff] }
 0x125   :  { %716 = vst.msk [vmem:[#allocation2 + $0x70] sm:$0xff] %vm701_vm6, %v699_v57  ;;  %v774_v62 = vrot.slane %v728_v61, 1  ;;  %v744_v2 = vld [vmem:[#allocation2 + $0x51] ss:$2 sm:$0xff]  ;;  %v1501_v54 = vld [vmem:[%s2410_s1 + $0x48] ss:$0 sm:$0xff] }
 0x126   :  { %1866 = vpow2.f32 %v818_v41  ;;  %v809_v42 = vmin.f32 %v793_v60, 0.0  ;;  %v754_v10 = vmax.f32 %v728_v61, %v744_v2  ;;  %vm801_vm10 = vcmp.gt.f32.partialorder %v793_v60, 0.0 }
 0x127   :  { %v775_v0 = vsel %vm46_vm3, %v772_v53, %v774_v62  ;;  %v1923_v53 = vmov 0  }
 0x128   :  { %v1863_v3 = vpop.eup %1862  ;;  %v820_v4 = vmul.f32 1.442695, %v809_v42  ;;  %v794_v43 = vmax.f32 %v753_v63, %v775_v0  ;;  %v730_v5 = vld [vmem:[#allocation2 + $0x60] ss:$2 sm:$0xff]  ;;  %v746_v13 = vld [vmem:[#allocation2 + $0x61] ss:$2 sm:$0xff]  ;;  %1856 = vset.pattern.permute.xlu1 %v1923_v53  ;;  %1857 = vset.pattern.permute.xlu0 %v1923_v53 }
 0x129   :  { %v1493_v6 = vadd.f32 -1.0, %v1863_v3  ;;  %v776_v7 = vrot.slane %v730_v5, 1  ;;  %v755_v24 = vmax.f32 %v730_v5, %v746_v13 }
 0x12a   :  { %1868 = vpow2.f32 %v820_v4  ;;  %v810_v8 = vmin.f32 %v794_v43, 0.0  ;;  %vm802_vm11 = vcmp.gt.f32.partialorder %v794_v43, 0.0 }
 0x12b   :  { %v838_v11 = vsel %vm798_vm7, %v2239_v19, %v1493_v6  ;;  %v777_v12 = vsel %vm46_vm3, %v774_v62, %v776_v7 }
 0x12c   :  { %v1865_v14 = vpop.eup %1864  ;;  %1702 = vmatprep.mubr.msk.f32.mxu1 %vm701_vm6, %v838_v11  ;;  %v822_v15 = vmul.f32 1.442695, %v810_v8  ;;  %v795_v16 = vmax.f32 %v754_v10, %v777_v12  ;;  %v732_v17 = vld [vmem:[#allocation2 + $0x70] ss:$2 sm:$0xff]  ;;  %v748_v18 = vld [vmem:[#allocation2 + $0x71] ss:$2 sm:$0xff] }
 0x12d   :  { %v1494_v20 = vadd.f32 -1.0, %v1865_v14  ;;  %v778_v21 = vrot.slane %v732_v17, 1  ;;  %v756_v22 = vmax.f32 %v732_v17, %v748_v18 }
 0x12e   :  { %1870 = vpow2.f32 %v822_v15  ;;  %v811_v23 = vmin.f32 %v795_v16, 0.0  ;;  %vm803_vm12 = vcmp.gt.f32.partialorder %v795_v16, 0.0 }
 0x12f   :  { %v839_v19 = vsel %vm799_vm8, %v2248_v33, %v1494_v20  ;;  %v779_v25 = vsel %vm46_vm3, %v776_v7, %v778_v21  ;;  %v789_v26 = vsel %vm46_vm3, %v778_v21, %v765_v9 }
 0x130   :  { %v1867_v27 = vpop.eup %1866  ;;  %1703 = vmatmul.mubr.msk.f32.vlgmr.msra.gmra.mrb[14].mxu1 %vm701_vm6, %v839_v19  ;;  %v824_v28 = vmul.f32 1.442695, %v811_v23  ;;  %v796_v29 = vmax.f32 %v755_v24, %v779_v25  ;;  %v797_v30 = vmax.f32 %v756_v22, %v789_v26 }
 0x131   :  { %v1495_v31 = vadd.f32 -1.0, %v1867_v27 }
 0x132   :  { %1872 = vpow2.f32 %v824_v28  ;;  %v812_v32 = vmin.f32 %v796_v29, 0.0  ;;  %v813_v35 = vmin.f32 %v797_v30, 0.0  ;;  %vm804_vm13 = vcmp.gt.f32.partialorder %v796_v29, 0.0 }
 0x133   :  { %v840_v34 = vsel %vm800_vm9, %v792_v40, %v1495_v31  ;;  %vm805_vm14 = vcmp.gt.f32.partialorder %v797_v30, 0.0  ;;  %vm1164_vm9 = vcmask 1041409  }
 0x134   :  { %v1869_v36 = vpop.eup %1868  ;;  %1705 = vmatprep.mubr.msk.f32.mxu1 %vm701_vm6, %v840_v34  ;;  %v826_v33 = vmul.f32 1.442695, %v812_v32  ;;  %v828_v1 = vmul.f32 1.442695, %v813_v35  ;;  %v1924_v34 = vmov 1  }
 0x135   :  { %v1496_v37 = vadd.f32 -1.0, %v1869_v36 }
 0x136   :  { %1874 = vpow2.f32 %v826_v33 }
 0x137   :  { %v841_v9 = vsel %vm801_vm10, %v793_v60, %v1496_v37  ;;  %1876 = vpow2.f32 %v828_v1 }
 0x138   :  { %v1871_v38 = vpop.eup %1870  ;;  %1706 = vmatmul.mubr.msk.f32.gmra.mrb[16].mxu1 %vm701_vm6, %v841_v9  ;;  %v1146_v9 = vld [vmem:[%s2410_s1 + $0x68] sm:$0xff] }
 0x139   :  { %v1497_v44 = vadd.f32 -1.0, %v1871_v38  ;;  %v1147_v38 = vld [vmem:[%s2410_s1 + $0x70] sm:$0xff] }
 0x13b   :  { %v842_v45 = vsel %vm802_vm11, %v794_v43, %v1497_v44  ;;  %v1786_v44 = vpack.c.bf16 %v1147_v38, %v1146_v9  ;;  %vm1167_vm11 = vcmask 1042434  }
 0x13c   :  { %v1873_v46 = vpop.eup %1872  ;;  %1708 = vmatprep.mubr.msk.f32.mxu1 %vm701_vm6, %v842_v45  ;;  %v1925_v45 = vmov 0.0|0.0  }
 0x13d   :  { %v1498_v39 = vadd.f32 -1.0, %v1873_v46  ;;  %1785 = vmatprep.subr.bf16.mxu1 %v1925_v45  ;;  %v1148_v46 = vld [vmem:[%s2410_s1 + $0x78] sm:$0xff] }
 0x13e   :  { %1787 = vmatpush3.bf16.msra.mxu1 %v1786_v44 }
 0x13f   :  { %v843_v47 = vsel %vm803_vm12, %v795_v16, %v1498_v39  ;;  %v1149_v39 = vld [vmem:[%s2410_s1 + $0x80] sm:$0xff]  ;;  %1788 = vmatprep.subr.bf16.mxu1 %v1925_v45  ;;  %vm1170_vm12 = vcmask 1043459  }
 0x140   :  { %v1875_v48 = vpop.eup %1874  ;;  %1709 = vmatmul.mubr.msk.f32.gmra.mrb[18].mxu1 %vm701_vm6, %v843_v47  ;;  %v1789_v47 = vpack.c.bf16 %v1149_v39, %v1148_v46 }
 0x141   :  { %v1877_v49 = vpop.eup %1876  ;;  %v1499_v50 = vadd.f32 -1.0, %v1875_v48  ;;  %v1927_v48 = vmov 0.0  }
 0x142   :  { %v1500_v40 = vadd.f32 -1.0, %v1877_v49  ;;  %v1150_v49 = vld [vmem:[%s2410_s1 + $0x88] sm:$0xff]  ;;  %1790 = vmatpush3.bf16.msra.mxu1 %v1789_v47 }
 0x143   :  { %v844_v51 = vsel %vm804_vm13, %v796_v29, %v1499_v50  ;;  %v1151_v50 = vld [vmem:[%s2410_s1 + $0x90] sm:$0xff]  ;;  %1791 = vmatprep.subr.bf16.mxu1 %v1925_v45 }
 0x144   :  { %1711 = vmatprep.mubr.msk.f32.mxu1 %vm701_vm6, %v844_v51  ;;  %v845_v52 = vsel %vm805_vm14, %v797_v30, %v1500_v40  ;;  %v1792_v40 = vpack.c.bf16 %v1151_v50, %v1150_v49  ;;  %v1152_v51 = vld [vmem:[%s2410_s1 + $0x98] sm:$0xff]  ;;  %vm1351_vm14 = vcmask 261120  }
 0x145   :  { %1712 = vmatmul.mubr.msk.f32.gmra.mrb[20].mxu1 %vm701_vm6, %v845_v52  ;;  %v1153_v52 = vld [vmem:[%s2410_s1 + $0xa0] sm:$0xff] }
 0x146   :  { %1730 = vmatprep.mubr.msk.f32.mxu1 %vm1926_vm4, %v1927_v48  ;;  %1793 = vmatpush3.bf16.msra.mxu1 %v1792_v40 }
 0x147   :  { %1794 = vmatprep.subr.bf16.mxu1 %v1925_v45 }
 0x203   :  { %v1704_v55 = vpop.f32.mrb[14].mxu1 }
 0x204   :  { %v949_v56 = vadd.f32 %v1704_v55, %v1501_v54  ;;  %v943_v57 = vpop.f32.mrb[15].mxu1  ;;  %v1059_v55 = vld [vmem:[%s2410_s1 + $0x58] sm:$0xff] }
 0x205   :  { %v944_v58 = vadd.f32 %v1501_v54, %v943_v57  ;;  %v1034_v57 = vld [vmem:[%s2410_s1 + $0x50] sm:$0xff] }
 0x206   :  { %984 = vst.msk [vmem:[#allocation3 + $0x8] sm:$0xff] %vm982_vm15, %v949_v56 }
 0x207   :  { %983 = vst.msk [vmem:[#allocation3] sm:$0xff] %vm982_vm15, %v944_v58 }
 0x20b   :  { %v1707_v59 = vpop.f32.mrb[16].mxu1 }
 0x20c   :  { %v959_v41 = vadd.f32 %v1707_v59, %v1501_v54  ;;  %v953_v60 = vpop.f32.mrb[17].mxu1 }
 0x20d   :  { %v954_v61 = vadd.f32 %v1501_v54, %v953_v60 }
 0x20e   :  { %986 = vst.msk [vmem:[#allocation3 + $0x18] sm:$0xff] %vm982_vm15, %v959_v41  ;;  %v991_v62 = vld [vmem:[#allocation3] ss:$2 sm:$0xff]  ;;  %v999_v42 = vld [vmem:[#allocation3 + $0x1] ss:$2 sm:$0xff] }
 0x20f   :  { %985 = vst.msk [vmem:[#allocation3 + $0x10] sm:$0xff] %vm982_vm15, %v954_v61  ;;  %v1006_v63 = vmax.f32 %v991_v62, %v999_v42 }
 0x211   :  { %v1014_v0 = vmin.f32 %v1006_v63, 0.0  ;;  %vm1010_vm0 = vcmp.gt.f32.partialorder %v1006_v63, 0.0 }
 0x213   :  { %v1710_v2 = vpop.f32.mrb[18].mxu1  ;;  %v1018_v3 = vmul.f32 1.442695, %v1014_v0 }
 0x214   :  { %v969_v4 = vadd.f32 %v1710_v2, %v1501_v54  ;;  %v963_v43 = vpop.f32.mrb[19].mxu1 }
 0x215   :  { %v964_v5 = vadd.f32 %v1501_v54, %v963_v43  ;;  %1878 = vpow2.f32 %v1018_v3 }
 0x216   :  { %988 = vst.msk [vmem:[#allocation3 + $0x28] sm:$0xff] %vm982_vm15, %v969_v4  ;;  %v993_v6 = vld [vmem:[#allocation3 + $0x10] ss:$2 sm:$0xff]  ;;  %v1001_v7 = vld [vmem:[#allocation3 + $0x11] ss:$2 sm:$0xff] }
 0x217   :  { %987 = vst.msk [vmem:[#allocation3 + $0x20] sm:$0xff] %vm982_vm15, %v964_v5  ;;  %v1007_v8 = vmax.f32 %v993_v6, %v1001_v7 }
 0x218   :  { %v1713_v10 = vpop.f32.mrb[20].mxu1 }
 0x219   :  { %v979_v11 = vadd.f32 %v1713_v10, %v1501_v54  ;;  %v973_v12 = vpop.f32.mrb[21].mxu1  ;;  %v1015_v13 = vmin.f32 %v1007_v8, 0.0  ;;  %vm1011_vm1 = vcmp.gt.f32.partialorder %v1007_v8, 0.0 }
 0x21a   :  { %v974_v14 = vadd.f32 %v1501_v54, %v973_v12 }
 0x21b   :  { %990 = vst.msk [vmem:[#allocation3 + $0x38] sm:$0xff] %vm982_vm15, %v979_v11  ;;  %v1020_v15 = vmul.f32 1.442695, %v1015_v13 }
 0x21c   :  { %989 = vst.msk [vmem:[#allocation3 + $0x30] sm:$0xff] %vm982_vm15, %v974_v14  ;;  %v1514_v14 = vld [vmem:[%s2410_s1 + $0x60] ss:$0 sm:$0xff] }
 0x21d   :  { %1880 = vpow2.f32 %v1020_v15 }
 0x21e   :  { %v995_v16 = vld [vmem:[#allocation3 + $0x20] ss:$2 sm:$0xff]  ;;  %v1003_v17 = vld [vmem:[#allocation3 + $0x21] ss:$2 sm:$0xff] }
 0x21f   :  { %v1879_v18 = vpop.eup %1878  ;;  %v1008_v20 = vmax.f32 %v995_v16, %v1003_v17 }
 0x220   :  { %v1510_v21 = vadd.f32 -1.0, %v1879_v18 }
 0x221   :  { %v1016_v22 = vmin.f32 %v1008_v20, 0.0  ;;  %vm1012_vm2 = vcmp.gt.f32.partialorder %v1008_v20, 0.0 }
 0x222   :  { %v1030_v23 = vsel %vm1010_vm0, %v1006_v63, %v1510_v21  ;;  %vm1425_vm0 = vcmask 27648  }
 0x223   :  { %1037 = vperm.xlu1 %1856, %v1030_v23   ;;  %v1022_v24 = vmul.f32 1.442695, %v1016_v22  ;;  %v997_v19 = vld [vmem:[#allocation3 + $0x30] ss:$2 sm:$0xff]  ;;  %v1005_v25 = vld [vmem:[#allocation3 + $0x31] ss:$2 sm:$0xff] }
 0x224   :  { %v1009_v26 = vmax.f32 %v997_v19, %v1005_v25 }
 0x225   :  { %1882 = vpow2.f32 %v1022_v24 }
 0x226   :  { %v1017_v27 = vmin.f32 %v1009_v26, 0.0  ;;  %vm1013_vm3 = vcmp.gt.f32.partialorder %v1009_v26, 0.0 }
 0x227   :  { %v1881_v28 = vpop.eup %1880 }
 0x228   :  { %v1511_v29 = vadd.f32 -1.0, %v1881_v28  ;;  %v1024_v30 = vmul.f32 1.442695, %v1017_v27 }
 0x22a   :  { %v1031_v31 = vsel %vm1011_vm1, %v1007_v8, %v1511_v29  ;;  %1884 = vpow2.f32 %v1024_v30 }
 0x22b   :  { %1042 = vperm.xlu0 %1857, %v1031_v31  }
 0x22f   :  { %v1883_v32 = vpop.eup %1882  ;;  %1858 = vset.pattern.permute.xlu0 %v1924_v34 }
 0x230   :  { %1065 = vperm.xlu0 %1858, %v1031_v31   ;;  %v1512_v35 = vadd.f32 -1.0, %v1883_v32 }
 0x232   :  { %v1032_v36 = vsel %vm1012_vm2, %v1008_v20, %v1512_v35 }
 0x233   :  { %1047 = vperm.xlu1 %1856, %v1032_v36  }
 0x234   :  { %v1885_v33 = vpop.eup %1884  ;;  %1860 = vset.pattern.permute.xlu0 %v1923_v53  ;;  %v1795_v53 = vpack.c.bf16 %v1153_v52, %v1152_v51 }
 0x235   :  { %v1513_v37 = vadd.f32 -1.0, %v1885_v33 }
 0x236   :  { %1796 = vmatpush3.bf16.msra.mxu1 %v1795_v53 }
 0x237   :  { %1859 = vset.pattern.permute.xlu1 %v1924_v34  ;;  %v1033_v1 = vsel %vm1013_vm3, %v1009_v26, %v1513_v37  ;;  %1797 = vmatprep.subr.bf16.mxu1 %v1925_v45 }
 0x238   :  { %1069 = vperm.xlu1 %1859, %v1032_v36   ;;  %1052 = vperm.xlu0 %1860, %v1033_v1  }
 0x23c   :  { %1061 = vperm.xlu1 %1859, %v1030_v23   ;;  %1861 = vset.pattern.permute.xlu0 %v1924_v34 }
 0x240   :  { %1073 = vperm.xlu1 %1859, %v1033_v1  }
 0x2a2   :  { %v1038_v56 = vpop.permute.xlu1 %1037 }
 0x2a3   :  { %v1055_v7 = vmul.f32 %v1038_v56, %v1034_v57 }
 0x2aa   :  { %v1043_v54 = vpop.permute.xlu0 %1042 }
 0x2ab   :  { %v1056_v59 = vmul.f32 %v1043_v54, %v1034_v57 }
 0x2af   :  { %v1066_v58 = vpop.permute.xlu0 %1065 }
 0x2b0   :  { %v1077_v41 = vmul.f32 %v1066_v58, %v1059_v55 }
 0x2b2   :  { %v1081_v60 = vadd.f32 %v1077_v41, %v1056_v59  ;;  %v1048_v61 = vpop.permute.xlu1 %1047 }
 0x2b3   :  { %v1057_v2 = vmul.f32 %v1048_v61, %v1034_v57 }
 0x2b4   :  { %v1092_v62 = vsel %vm1084_vm5, %v1081_v60, 0.0 }
 0x2b5   :  { %v1093_v42 = vrot.slane %v1092_v62, 4 }
 0x2b7   :  { %v1094_v63 = vadd.f32 %v1093_v42, %v1092_v62  ;;  %v1070_v0 = vpop.permute.xlu1 %1069  ;;  %v1053_v13 = vpop.permute.xlu0 %1052 }
 0x2b8   :  { %v1078_v3 = vmul.f32 %v1070_v0, %v1059_v55  ;;  %v1058_v20 = vmul.f32 %v1053_v13, %v1034_v57 }
 0x2b9   :  { %v1095_v4 = vrot.slane %v1094_v63, 2 }
 0x2ba   :  { %v1082_v43 = vadd.f32 %v1078_v3, %v1057_v2 }
 0x2bb   :  { %v1096_v5 = vadd.f32 %v1095_v4, %v1094_v63  ;;  %v1062_v6 = vpop.permute.xlu1 %1061 }
 0x2bc   :  { %v1099_v8 = vsel %vm1084_vm5, %v1082_v43, 0.0  ;;  %v1076_v10 = vmul.f32 %v1062_v6, %v1059_v55 }
 0x2bd   :  { %v1097_v11 = vrot.slane %v1096_v5, 1  ;;  %v1100_v12 = vrot.slane %v1099_v8, 4 }
 0x2be   :  { %v1080_v15 = vadd.f32 %v1076_v10, %v1055_v7  ;;  %v1250_v7 = vld [vmem:[%s2410_s1 + $0xb0] sm:$0xff] }
 0x2bf   :  { %v1098_v16 = vadd.f32 %v1097_v11, %v1096_v5  ;;  %v1101_v17 = vadd.f32 %v1100_v12, %v1099_v8  ;;  %v1074_v18 = vpop.permute.xlu1 %1073  ;;  %v1251_v8 = vld [vmem:[%s2410_s1 + $0xb8] sm:$0xff]  ;;  %v1252_v11 = vld [vmem:[%s2410_s1 + $0xc0] sm:$0xff]  ;;  %v1253_v12 = vld [vmem:[%s2410_s1 + $0xc8] sm:$0xff] }
 0x2c0   :  { %v1085_v21 = vsel %vm1084_vm5, %v1080_v15, 0.0  ;;  %v1079_v22 = vmul.f32 %v1074_v18, %v1059_v55  ;;  %v1798_v10 = vpack.c.bf16 %v1251_v8, %v1250_v7  ;;  %v1801_v13 = vpack.c.bf16 %v1253_v12, %v1252_v11  ;;  %v1255_v15 = vld [vmem:[%s2410_s1 + $0xd8] sm:$0xff]  ;;  %v1257_v18 = vld [vmem:[%s2410_s1 + $0xe8] sm:$0xff] }
 0x2c1   :  { %v1119_v23 = vadd.f32 %v1514_v14, %v1098_v16  ;;  %v1102_v24 = vrot.slane %v1101_v17, 2  ;;  %v1086_v19 = vrot.slane %v1085_v21, 4 }
 0x2c2   :  { %v1083_v25 = vadd.f32 %v1079_v22, %v1058_v20 }
 0x2c3   :  { %v1103_v26 = vadd.f32 %v1102_v24, %v1101_v17  ;;  %v1087_v27 = vadd.f32 %v1086_v19, %v1085_v21  ;;  %v1127_v29 = vmin.f32 %v1119_v23, 0.0  ;;  %vm1123_vm6 = vcmp.gt.f32.partialorder %v1119_v23, 0.0  ;;  %v1256_v17 = vld [vmem:[%s2410_s1 + $0xe0] sm:$0xff]  ;;  %v1519_v21 = vld [vmem:[%s2410_s1 + $0xa8] ss:$0 sm:$0xff] }
 0x2c4   :  { %v1106_v28 = vsel %vm1084_vm5, %v1083_v25, 0.0  ;;  %v1807_v20 = vpack.c.bf16 %v1257_v18, %v1256_v17 }
 0x2c5   :  { %v1104_v30 = vrot.slane %v1103_v26, 1  ;;  %v1088_v31 = vrot.slane %v1087_v27, 2  ;;  %v1107_v32 = vrot.slane %v1106_v28, 4  ;;  %v1132_v33 = vmul.f32 1.442695, %v1127_v29  ;;  %v1342_v29 = vld [vmem:[%s2410_s1 + $0xf8] sm:$0xff] }
 0x2c7   :  { %v1105_v34 = vadd.f32 %v1104_v30, %v1103_v26  ;;  %v1089_v35 = vadd.f32 %v1088_v31, %v1087_v27  ;;  %v1108_v36 = vadd.f32 %v1107_v32, %v1106_v28  ;;  %1886 = vpow2.f32 %v1132_v33  ;;  %v1343_v30 = vld [vmem:[%s2410_s1 + $0x100] sm:$0xff]  ;;  %v1344_v32 = vld [vmem:[%s2410_s1 + $0x108] sm:$0xff] }
 0x2c8   :  { %v1810_v31 = vpack.c.bf16 %v1343_v30, %v1342_v29 }
 0x2c9   :  { %v1120_v37 = vadd.f32 %v1514_v14, %v1105_v34  ;;  %v1090_v1 = vrot.slane %v1089_v35, 1  ;;  %v1109_v9 = vrot.slane %v1108_v36, 2 }
 0x2cb   :  { %v1128_v38 = vmin.f32 %v1120_v37, 0.0  ;;  %v1091_v44 = vadd.f32 %v1090_v1, %v1089_v35  ;;  %v1110_v46 = vadd.f32 %v1109_v9, %v1108_v36  ;;  %vm1124_vm8 = vcmp.gt.f32.partialorder %v1120_v37, 0.0  ;;  %v1522_v35 = vld [vmem:[%s2410_s1 + $0xf0] ss:$0 sm:$0xff] }
 0x2cd   :  { %v1134_v39 = vmul.f32 1.442695, %v1128_v38  ;;  %v1118_v47 = vadd.f32 %v1514_v14, %v1091_v44  ;;  %v1111_v49 = vrot.slane %v1110_v46, 1 }
 0x2cf   :  { %v1126_v50 = vmin.f32 %v1118_v47, 0.0  ;;  %v1112_v40 = vadd.f32 %v1111_v49, %v1110_v46  ;;  %1888 = vpow2.f32 %v1134_v39  ;;  %vm1122_vm7 = vcmp.gt.f32.partialorder %v1118_v47, 0.0  ;;  %v1525_v46 = vld [vmem:[%s2410_s1 + $0x118] ss:$0 sm:$0xff] }
 0x2d1   :  { %v1130_v51 = vmul.f32 1.442695, %v1126_v50  ;;  %v1121_v52 = vadd.f32 %v1514_v14, %v1112_v40  ;;  %v1887_v55 = vpop.eup %1886  ;;  %v1254_v14 = vld [vmem:[%s2410_s1 + $0xd0] sm:$0xff] }
 0x2d2   :  { %v1516_v57 = vadd.f32 -1.0, %v1887_v55  ;;  %v1804_v16 = vpack.c.bf16 %v1255_v15, %v1254_v14 }
 0x2d3   :  { %1890 = vpow2.f32 %v1130_v51  ;;  %v1129_v53 = vmin.f32 %v1121_v52, 0.0  ;;  %vm1125_vm10 = vcmp.gt.f32.partialorder %v1121_v52, 0.0 }
 0x2d4   :  { %v1143_v41 = vsel %vm1123_vm6, %v1119_v23, %v1516_v57 }
 0x2d5   :  { %v1136_v54 = vmul.f32 1.442695, %v1129_v53  ;;  %v1163_v42 = vrot.slane %v1143_v41, 7 }
 0x2d7   :  { %1892 = vpow2.f32 %v1136_v54 }
 0x2d9   :  { %v1889_v56 = vpop.eup %1888 }
 0x2da   :  { %v1517_v59 = vadd.f32 -1.0, %v1889_v56 }
 0x2dc   :  { %v1144_v63 = vsel %vm1124_vm8, %v1120_v37, %v1517_v59 }
 0x2dd   :  { %v1891_v58 = vpop.eup %1890  ;;  %v1166_v4 = vrot.slane %v1144_v63, 6 }
 0x2de   :  { %v1515_v60 = vadd.f32 -1.0, %v1891_v58 }
 0x2e0   :  { %v1142_v61 = vsel %vm1122_vm7, %v1118_v47, %v1515_v60 }
 0x2e1   :  { %v1893_v62 = vpop.eup %1892  ;;  %v1165_v2 = vsel %vm1164_vm9, %v1163_v42, %v1142_v61 }
 0x2e2   :  { %v1518_v0 = vadd.f32 -1.0, %v1893_v62  ;;  %v1168_v5 = vsel %vm1167_vm11, %v1166_v4, %v1165_v2 }
 0x2e4   :  { %v1145_v3 = vsel %vm1125_vm10, %v1121_v52, %v1518_v0 }
 0x2e5   :  { %v1169_v43 = vrot.slane %v1145_v3, 5 }
 0x2e7   :  { %v1171_v6 = vsel %vm1170_vm12, %v1169_v43, %v1168_v5 }
 0x2e8   :  { %1731 = vmatmul.mubr.msk.f32.vlgmr.msra.gmra.mrb[22].mxu1 %vm1084_vm5, %v1171_v6 }
 0x2e9   :  { %1749 = vmatprep.mubr.msk.f32.mxu1 %vm1926_vm4, %v1927_v48  ;;  %1799 = vmatpush3.bf16.msra.mxu1 %v1798_v10 }
 0x2ea   :  { %1800 = vmatprep.subr.bf16.mxu1 %v1925_v45 }
 0x2ed   :  { %1802 = vmatpush3.bf16.msra.mxu1 %v1801_v13 }
 0x2ee   :  { %1803 = vmatprep.subr.bf16.mxu1 %v1925_v45 }
 0x2f1   :  { %1805 = vmatpush3.bf16.msra.mxu1 %v1804_v16 }
 0x2f2   :  { %1806 = vmatprep.subr.bf16.mxu1 %v1925_v45 }
 0x2f5   :  { %1808 = vmatpush3.bf16.msra.mxu1 %v1807_v20 }
 0x2f6   :  { %1809 = vmatprep.subr.bf16.mxu1 %v1925_v45 }
 0x3bb   :  { %v1240_v22 = vpop.f32.mrb[22].mxu1 }
 0x3bc   :  { %v1241_v23 = vadd.f32 %v1519_v21, %v1240_v22  ;;  %v1732_v24 = vpop.f32.mrb[23].mxu1 }
 0x3be   :  { %v1245_v19 = vmin.f32 %v1241_v23, 0.0  ;;  %vm1244_vm13 = vcmp.gt.f32.partialorder %v1241_v23, 0.0 }
 0x3c0   :  { %v1246_v25 = vmul.f32 1.442695, %v1245_v19 }
 0x3c2   :  { %1894 = vpow2.f32 %v1246_v25 }
 0x3cc   :  { %v1895_v26 = vpop.eup %1894 }
 0x3cd   :  { %v1521_v27 = vadd.f32 -1.0, %v1895_v26 }
 0x3cf   :  { %v1249_v28 = vsel %vm1244_vm13, %v1241_v23, %v1521_v27 }
 0x3d0   :  { %1750 = vmatmul.mubr.msk.f32.vlgmr.msra.gmra.mrb[24].mxu1 %vm1084_vm5, %v1249_v28 }
 0x3d1   :  { %1760 = vmatprep.mubr.msk.f32.mxu1 %vm1926_vm4, %v1927_v48  ;;  %1811 = vmatpush3.bf16.msra.mxu1 %v1810_v31  ;;  %v1345_v48 = vld [vmem:[%s2410_s1 + $0x110] sm:$0xff] }
 0x3d2   :  { %1812 = vmatprep.subr.bf16.mxu1 %v1925_v45  ;;  %v1813_v34 = vpack.c.bf16 %v1345_v48, %v1344_v32 }
 0x3d5   :  { %1814 = vmatpush3.bf16.msra.mxu1 %v1813_v34 }
 0x4a3   :  { %v1332_v36 = vpop.f32.mrb[24].mxu1 }
 0x4a4   :  { %v1333_v33 = vadd.f32 %v1522_v35, %v1332_v36  ;;  %v1751_v37 = vpop.f32.mrb[25].mxu1 }
 0x4a6   :  { %v1337_v1 = vmin.f32 %v1333_v33, 0.0  ;;  %vm1336_vm15 = vcmp.gt.f32.partialorder %v1333_v33, 0.0 }
 0x4a8   :  { %v1338_v9 = vmul.f32 1.442695, %v1337_v1 }
 0x4aa   :  { %1896 = vpow2.f32 %v1338_v9 }
 0x4b4   :  { %v1897_v45 = vpop.eup %1896 }
 0x4b5   :  { %v1524_v38 = vadd.f32 -1.0, %v1897_v45 }
 0x4b7   :  { %v1341_v44 = vsel %vm1336_vm15, %v1333_v33, %v1524_v38 }
 0x4b8   :  { %1761 = vmatmul.mubr.msk.f32.vlgmr.msra.gmra.mrb[26].mxu1 %vm1351_vm14, %v1341_v44 }
 0x58b   :  { %v1421_v39 = vpop.f32.mrb[26].mxu1 }
 0x58c   :  { %v1422_v47 = vadd.f32 %v1525_v46, %v1421_v39  ;;  %v1762_v49 = vpop.f32.mrb[27].mxu1 }
 0x58e   :  { %1426 = vst.msk [vmem:[#allocation4] sm:$0xf] %vm1425_vm0, %v1422_v47 }
 0x58f   :  { %1909 = shalt.err (!%p1906_p4)
}
 0x590   :  { %s1910_s3 = scalar_lea.hbm %s2411_s2, 64 }
 0x591   :  { %p1911_p5 = scmp.ne.s32.totalorder %s2411_s2, %s1910_s3  ;;  %p1914_p6 = scmp.lt.u32.totalorder %s1910_s3, %s2411_s2 }
 0x593   :  { %p1916_p7 = pnand %p1914_p6, %p1911_p5 }
 0x595   :  { %1919 = shalt.err (!%p1916_p7)
}
 0x596   :  { %1436 = dma.vmem_to_hbm [thread:$0]  %s1434_s27, 64, %s2411_s2, [#allocation5]  }
 0x597   :  { %1920 = dma.done.wait [#allocation5], 64  }
 0x598   :  { %1921 = vsyncadd [#allocation5], 4294967232 }
 0x599   :  { %1440 = vsyncpa [#allocation5], 1 }

</bundles_post_ra>
